<compile_context>
chip_gen: v5e
topology: v5e:2x2
jax: 0.10.0
libtpu: 0.0.40
codegen_flags: <defaults>
</compile_context>

<pallas_src>
import functools

import jax
import jax.numpy as jnp
from jax import lax
from jax.experimental import pallas as pl
from jax.experimental.pallas import tpu as pltpu

_NEG = -1.0e30  # "minus infinity" that stays NaN-free through max/exp algebra


def _row_multiple(dtype) -> int:
    """Packed-tile row granularity: 8 for f32, 16 for bf16, 32 for 8-bit."""
    bits = jnp.dtype(dtype).itemsize * 8
    return max(8, 256 // bits)


def _logit_fns(margin, gamma):
    delta_p = 1.0 - margin
    delta_n = margin

    def logits_p(x):
        ap = jnp.maximum((1.0 + margin) - x, 0.0)
        return -ap * (x - delta_p) * gamma

    def logits_n(x):
        an = jnp.maximum(x + margin, 0.0)
        return an * (x - delta_n) * gamma

    return logits_p, logits_n


def _softplus(z):
    return jnp.maximum(z, 0.0) + jnp.log1p(jnp.exp(-jnp.abs(z)))


# -----------------------------------------------------------------------------
# Small-N fast path: one grid step, whole arrays resident, direct LSE.
# -----------------------------------------------------------------------------
def _circle_small_kernel(sp_ref, sn_ref, out_ref, *, margin, gamma,
                         n_p, n_n, mask_p, mask_n):
    logits_p, logits_n = _logit_fns(margin, gamma)

    def lse(x_ref, n_valid, need_mask, make_logits):
        x = x_ref[...].astype(jnp.float32)
        logits = make_logits(x)
        if need_mask:  # only the padded tail of the last row needs masking
            r = lax.broadcasted_iota(jnp.int32, x.shape, 0)
            c = lax.broadcasted_iota(jnp.int32, x.shape, 1)
            logits = jnp.where(r * 128 + c < n_valid, logits, _NEG)
        gmax = jnp.max(logits)
        return gmax + jnp.log(jnp.sum(jnp.exp(logits - gmax)))

    z = lse(sp_ref, n_p, mask_p, logits_p) + lse(sn_ref, n_n, mask_n, logits_n)
    out_ref[0] = _softplus(z)


# -----------------------------------------------------------------------------
# Streaming path: online (max, sum) logsumexp with vreg-sized accumulators.
# -----------------------------------------------------------------------------
def _fold(x_ref, m_ref, s_ref, *, sub, nck, make_logits, limit):
    """Fold the current (nck*sub, 128) tile into (sub, 128) running (max, sum).

    `limit` is None for fully-valid blocks, else the number of valid elements
    in this block (block-local flat index < limit).
    """
    if limit is not None:
        r = lax.broadcasted_iota(jnp.int32, (sub, 128), 0)
        c = lax.broadcasted_iota(jnp.int32, (sub, 128), 1)
        base = r * 128 + c  # hoisted out of the chunk loop
    else:
        base = None

    def chunk_update(row0, m, s):
        x = x_ref[pl.ds(row0, sub), :].astype(jnp.float32)
        logit = make_logits(x)
        if limit is not None:
            logit = jnp.where(row0 * 128 + base < limit, logit, _NEG)
        m_new = jnp.maximum(m, logit)
        s_new = s * jnp.exp(m - m_new) + jnp.exp(logit - m_new)
        return m_new, s_new

    m0, s0 = m_ref[...], s_ref[...]
    if nck == 1:
        m1, s1 = chunk_update(0, m0, s0)
    else:
        def body(ck, carry):
            row0 = pl.multiple_of(ck * sub, sub)
            return chunk_update(row0, *carry)

        unroll = 8 if nck % 8 == 0 else True
        m1, s1 = lax.fori_loop(0, nck, body, (m0, s0), unroll=unroll)
    m_ref[...] = m1
    s_ref[...] = s1


def _circle_stream_kernel(sp_ref, sn_ref, out_ref,
                          mp_ref, sp_sum_ref, mn_ref, sn_sum_ref,
                          *, margin, gamma,
                          nb_p, sub_p, nck_p, rem_p,
                          nb_n, sub_n, nck_n, rem_n):
    i = pl.program_id(0)
    logits_p, logits_n = _logit_fns(margin, gamma)

    # ---- init running (max, sum) accumulators --------------------------------
    @pl.when(i == 0)
    def _():
        mp_ref[...] = jnp.full_like(mp_ref, _NEG)
        mn_ref[...] = jnp.full_like(mn_ref, _NEG)
        sp_sum_ref[...] = jnp.zeros_like(sp_sum_ref)
        sn_sum_ref[...] = jnp.zeros_like(sn_sum_ref)

    def process(x_ref, m_ref, s_ref, nb, sub, nck, rem, make_logits):
        block_elems = sub * nck * 128
        last_masked = rem < block_elems            # static Python bool
        n_unmasked = nb - 1 if last_masked else nb

        if n_unmasked > 0:
            @pl.when(i < n_unmasked)
            def _():
                _fold(x_ref, m_ref, s_ref, sub=sub, nck=nck,
                      make_logits=make_logits, limit=None)

        if last_masked:
            @pl.when(i == nb - 1)
            def _():
                _fold(x_ref, m_ref, s_ref, sub=sub, nck=nck,
                      make_logits=make_logits, limit=rem)

    process(sp_ref, mp_ref, sp_sum_ref, nb_p, sub_p, nck_p, rem_p, logits_p)
    process(sn_ref, mn_ref, sn_sum_ref, nb_n, sub_n, nck_n, rem_n, logits_n)

    # ---- finalize: combine per-element accumulators into scalar LSEs ----------
    @pl.when(i == pl.num_programs(0) - 1)
    def _():
        def lse(m_acc, s_acc):
            mv = m_acc[...]
            gmax = jnp.max(mv)
            total = jnp.sum(s_acc[...] * jnp.exp(mv - gmax))
            return gmax + jnp.log(total)

        z = lse(mp_ref, sp_sum_ref) + lse(mn_ref, sn_sum_ref)
        out_ref[0] = _softplus(z)


# -----------------------------------------------------------------------------
# Wrapper
# -----------------------------------------------------------------------------
def circle_loss(sp, sn, m: float, gamma: float, *,
                block_rows: int = 2048, small_rows: int = 1024):
    """sp: (Np,) positive-pair scores, sn: (Nn,) negative-pair scores -> scalar."""
    margin = float(m)
    gamma = float(gamma)
    n_p = int(sp.shape[0])
    n_n = int(sn.shape[0])
    if n_p < 1 or n_n < 1:
        raise ValueError("CircleLoss needs at least one positive and one negative score.")

    def slab(x):
        n = int(x.shape[0])
        x = x.reshape(-1)
        rows = -(-n // 128)
        pad = rows * 128 - n
        if pad:
            # TODO(synk): when N % 128 != 0 this minimal pad still copies the
            # array once in HBM; a ragged 1-D tail block (or fusing the
            # upstream similarity GEMM) would remove it entirely.
            x = jnp.pad(x, (0, pad))
        return x.reshape(rows, 128), rows  # free reshape when no pad needed

    sp2, rows_p = slab(sp)
    sn2, rows_n = slab(sn)

    # ---- small-N fast path ----------------------------------------------------
    if rows_p <= small_rows and rows_n <= small_rows:
        kernel = functools.partial(
            _circle_small_kernel, margin=margin, gamma=gamma,
            n_p=n_p, n_n=n_n,
            mask_p=(n_p < rows_p * 128), mask_n=(n_n < rows_n * 128))
        out = pl.pallas_call(
            kernel,
            out_shape=jax.ShapeDtypeStruct((1,), jnp.float32),
            grid_spec=pltpu.PrefetchScalarGridSpec(
                num_scalar_prefetch=0,
                grid=(1,),
                in_specs=[
                    pl.BlockSpec((rows_p, 128), lambda i: (0, 0)),
                    pl.BlockSpec((rows_n, 128), lambda i: (0, 0)),
                ],
                out_specs=pl.BlockSpec(memory_space=pltpu.MemorySpace.SMEM),
            ),
            compiler_params=pltpu.CompilerParams(
                dimension_semantics=("arbitrary",)),
        )(sp2, sn2)
        return out[0]

    # ---- streaming path: per-input block plan ----------------------------------
    def plan(rows, n, dtype):
        mult = _row_multiple(dtype)
        cap = max(mult, (block_rows // mult) * mult)
        if rows <= cap:                       # single resident block (full array dims)
            b_rows, nb = rows, 1
            sub = mult if rows % mult == 0 else rows
        else:                                 # tiled along rows
            b_rows, nb = cap, -(-rows // cap)
            sub = mult
        nck = b_rows // sub
        rem = n - (nb - 1) * b_rows * 128     # valid elements in the last block
        return b_rows, nb, sub, nck, rem

    bp_rows, nb_p, sub_p, nck_p, rem_p = plan(rows_p, n_p, sp2.dtype)
    bn_rows, nb_n, sub_n, nck_n, rem_n = plan(rows_n, n_n, sn2.dtype)
    num_blocks = max(nb_p, nb_n)

    kernel = functools.partial(
        _circle_stream_kernel, margin=margin, gamma=gamma,
        nb_p=nb_p, sub_p=sub_p, nck_p=nck_p, rem_p=rem_p,
        nb_n=nb_n, sub_n=sub_n, nck_n=nck_n, rem_n=rem_n)

    out = pl.pallas_call(
        kernel,
        out_shape=jax.ShapeDtypeStruct((1,), jnp.float32),
        grid_spec=pltpu.PrefetchScalarGridSpec(
            num_scalar_prefetch=0,
            grid=(num_blocks,),
            in_specs=[
                # Single-block inputs resolve to a constant index map -> DMA'd
                # once and kept resident; tiled inputs stream block i.
                pl.BlockSpec((bp_rows, 128), lambda i: (jnp.minimum(i, nb_p - 1), 0)),
                pl.BlockSpec((bn_rows, 128), lambda i: (jnp.minimum(i, nb_n - 1), 0)),
            ],
            out_specs=pl.BlockSpec(memory_space=pltpu.MemorySpace.SMEM),
            scratch_shapes=[
                pltpu.VMEM((sub_p, 128), jnp.float32),  # running max (p)
                pltpu.VMEM((sub_p, 128), jnp.float32),  # running sum (p)
                pltpu.VMEM((sub_n, 128), jnp.float32),  # running max (n)
                pltpu.VMEM((sub_n, 128), jnp.float32),  # running sum (n)
            ],
        ),
        compiler_params=pltpu.CompilerParams(
            dimension_semantics=("arbitrary",)),
    )(sp2, sn2)
    return out[0]


def _reference(sp, sn, m, gamma):
    # Pure-JAX reference mirroring the PyTorch module, for verification.
    sp = sp.astype(jnp.float32)
    sn = sn.astype(jnp.float32)
    ap = jnp.maximum(-sp + 1 + m, 0.0)
    an = jnp.maximum(sn + m, 0.0)
    logit_p = -ap * (sp - (1 - m)) * gamma
    logit_n = an * (sn - m) * gamma
    z = jax.nn.logsumexp(logit_n, axis=0) + jax.nn.logsumexp(logit_p, axis=0)
    return jax.nn.softplus(z)


if __name__ == "__main__":
    m, gamma = 0.25, 80.0
    key = jax.random.PRNGKey(0)
    k1, k2, k3, k4, k5, k6 = jax.random.split(key, 6)

    # 1) Small case -> single-step fast path (sp exercises lane masking).
    sp = jax.random.uniform(k1, (64,), jnp.float32, minval=-1.0, maxval=1.0)
    sn = jax.random.uniform(k2, (128,), jnp.float32, minval=-1.0, maxval=1.0)
    loss = circle_loss(sp, sn, m, gamma)
    jax.block_until_ready(loss)
    ref = _reference(sp, sn, m, gamma)
    assert jnp.allclose(loss, ref, rtol=1e-4, atol=1e-4), (loss, ref)

    # 2) Multi-block streaming path with a small forced block size:
    #    sp (300) = odd single resident block, sn (20000) = 3 blocks + masked tail.
    sp_b = jax.random.uniform(k3, (300,), jnp.float32, minval=-1.0, maxval=1.0)
    sn_b = jax.random.uniform(k4, (20000,), jnp.float32, minval=-1.0, maxval=1.0)
    loss_b = circle_loss(sp_b, sn_b, m, gamma, block_rows=64, small_rows=0)
    jax.block_until_ready(loss_b)
    ref_b = _reference(sp_b, sn_b, m, gamma)
    assert jnp.allclose(loss_b, ref_b, rtol=1e-4, atol=1e-4), (loss_b, ref_b)

    # 3) Default-sized streaming path (2048-row / 1 MiB blocks, no host pad
    #    since 300032 % 128 == 0, masked partial last block).
    sp_c = jax.random.uniform(k5, (1000,), jnp.float32, minval=-1.0, maxval=1.0)
    sn_c = jax.random.uniform(k6, (300032,), jnp.float32, minval=-1.0, maxval=1.0)
    loss_c = circle_loss(sp_c, sn_c, m, gamma)
    jax.block_until_ready(loss_c)
    ref_c = _reference(sp_c, sn_c, m, gamma)
    assert jnp.allclose(loss_c, ref_c, rtol=1e-4, atol=1e-4), (loss_c, ref_c)

    print("KERNEL_OK")
</pallas_src>

<mosaic_0001>
module attributes {stable_mosaic.version = 11 : i64} {
  func.func @_circle_small_kernel(%arg0: i32, %arg1: memref<1x128xf32, #tpu.memory_space<vmem>>, %arg2: memref<1x128xf32, #tpu.memory_space<vmem>>, %arg3: memref<1xf32, #tpu.memory_space<smem>>) attributes {dimension_semantics = [#tpu.dimension_semantics<arbitrary>], iteration_bounds = array<i64: 1>, scalar_prefetch = 0 : i64, scratch_operands = 0 : i64, tpu.core_type = #tpu.core_type<tc>, window_params = [{pipeline_mode = #tpu.pipeline_mode<synchronous>, transform_indices = @transform_0, window_bounds = array<i64: 1, 128>}, {pipeline_mode = #tpu.pipeline_mode<synchronous>, transform_indices = @transform_1, window_bounds = array<i64: 1, 128>}, {transform_indices = @transform_2, window_bounds = array<i64: 1>}]} {
    %c0 = arith.constant 0 : index
    %c0_0 = arith.constant 0 : index
    %0 = vector.load %arg1[%c0, %c0_0] : memref<1x128xf32, #tpu.memory_space<vmem>>, vector<1x128xf32>
    %cst = arith.constant 1.250000e+00 : f32
    %1 = vector.broadcast %cst : f32 to vector<1x128xf32>
    %2 = arith.subf %1, %0 : vector<1x128xf32>
    %cst_1 = arith.constant 0.000000e+00 : f32
    %3 = vector.broadcast %cst_1 : f32 to vector<1x128xf32>
    %4 = arith.maximumf %2, %3 : vector<1x128xf32>
    %cst_2 = arith.constant 0.000000e+00 : f32
    %5 = vector.broadcast %cst_2 : f32 to vector<1x128xf32>
    %6 = arith.subf %5, %4 : vector<1x128xf32>
    %cst_3 = arith.constant 7.500000e-01 : f32
    %7 = vector.broadcast %cst_3 : f32 to vector<1x128xf32>
    %8 = arith.subf %0, %7 : vector<1x128xf32>
    %9 = arith.mulf %6, %8 : vector<1x128xf32>
    %cst_4 = arith.constant 8.000000e+01 : f32
    %10 = vector.broadcast %cst_4 : f32 to vector<1x128xf32>
    %11 = arith.mulf %9, %10 : vector<1x128xf32>
    %12 = tpu.iota {dimensions = array<i32: 0>} : vector<1x128xi32>
    %13 = tpu.iota {dimensions = array<i32: 1>} : vector<1x128xi32>
    %c128_i32 = arith.constant 128 : i32
    %14 = vector.broadcast %c128_i32 : i32 to vector<1x128xi32>
    %15 = arith.muli %12, %14 : vector<1x128xi32>
    %16 = arith.addi %15, %13 : vector<1x128xi32>
    %c64_i32 = arith.constant 64 : i32
    %17 = vector.broadcast %c64_i32 : i32 to vector<1x128xi32>
    %18 = arith.cmpi slt, %16, %17 : vector<1x128xi32>
    %cst_5 = arith.constant -1.000000e+30 : f32
    %19 = vector.broadcast %cst_5 : f32 to vector<1x128xf32>
    %20 = arith.select %18, %11, %19 : vector<1x128xi1>, vector<1x128xf32>
    %21 = vector.shape_cast %20 : vector<1x128xf32> to vector<1x1x128xf32>
    %cst_6 = arith.constant dense<0xFF800000> : vector<1xf32>
    %22 = vector.multi_reduction <maximumf>, %21, %cst_6 [1, 2] : vector<1x1x128xf32> to vector<1xf32>
    %23 = vector.shape_cast %22 : vector<1xf32> to vector<1x1x1xf32>
    %24 = vector.extract %23[0, 0, 0] : f32 from vector<1x1x1xf32>
    %25 = vector.broadcast %24 : f32 to vector<1x128xf32>
    %26 = arith.subf %20, %25 : vector<1x128xf32>
    %27 = math.exp %26 : vector<1x128xf32>
    %28 = vector.shape_cast %27 : vector<1x128xf32> to vector<1x1x128xf32>
    %cst_7 = arith.constant dense<0.000000e+00> : vector<1xf32>
    %29 = vector.multi_reduction <add>, %28, %cst_7 [1, 2] : vector<1x1x128xf32> to vector<1xf32>
    %30 = vector.shape_cast %29 : vector<1xf32> to vector<1x1x1xf32>
    %31 = vector.extract %30[0, 0, 0] : f32 from vector<1x1x1xf32>
    %32 = math.log %31 : f32
    %33 = arith.addf %24, %32 : f32
    %c0_8 = arith.constant 0 : index
    %c0_9 = arith.constant 0 : index
    %34 = vector.load %arg2[%c0_8, %c0_9] : memref<1x128xf32, #tpu.memory_space<vmem>>, vector<1x128xf32>
    %cst_10 = arith.constant 2.500000e-01 : f32
    %35 = vector.broadcast %cst_10 : f32 to vector<1x128xf32>
    %36 = arith.addf %34, %35 : vector<1x128xf32>
    %cst_11 = arith.constant 0.000000e+00 : f32
    %37 = vector.broadcast %cst_11 : f32 to vector<1x128xf32>
    %38 = arith.maximumf %36, %37 : vector<1x128xf32>
    %cst_12 = arith.constant 2.500000e-01 : f32
    %39 = vector.broadcast %cst_12 : f32 to vector<1x128xf32>
    %40 = arith.subf %34, %39 : vector<1x128xf32>
    %41 = arith.mulf %38, %40 : vector<1x128xf32>
    %cst_13 = arith.constant 8.000000e+01 : f32
    %42 = vector.broadcast %cst_13 : f32 to vector<1x128xf32>
    %43 = arith.mulf %41, %42 : vector<1x128xf32>
    %44 = vector.shape_cast %43 : vector<1x128xf32> to vector<1x1x128xf32>
    %cst_14 = arith.constant dense<0xFF800000> : vector<1xf32>
    %45 = vector.multi_reduction <maximumf>, %44, %cst_14 [1, 2] : vector<1x1x128xf32> to vector<1xf32>
    %46 = vector.shape_cast %45 : vector<1xf32> to vector<1x1x1xf32>
    %47 = vector.extract %46[0, 0, 0] : f32 from vector<1x1x1xf32>
    %48 = vector.broadcast %47 : f32 to vector<1x128xf32>
    %49 = arith.subf %43, %48 : vector<1x128xf32>
    %50 = math.exp %49 : vector<1x128xf32>
    %51 = vector.shape_cast %50 : vector<1x128xf32> to vector<1x1x128xf32>
    %cst_15 = arith.constant dense<0.000000e+00> : vector<1xf32>
    %52 = vector.multi_reduction <add>, %51, %cst_15 [1, 2] : vector<1x1x128xf32> to vector<1xf32>
    %53 = vector.shape_cast %52 : vector<1xf32> to vector<1x1x1xf32>
    %54 = vector.extract %53[0, 0, 0] : f32 from vector<1x1x1xf32>
    %55 = math.log %54 : f32
    %56 = arith.addf %47, %55 : f32
    %57 = arith.addf %33, %56 : f32
    %cst_16 = arith.constant 0.000000e+00 : f32
    %58 = arith.maximumf %57, %cst_16 : f32
    %59 = math.absf %57 : f32
    %cst_17 = arith.constant 0.000000e+00 : f32
    %60 = arith.subf %cst_17, %59 : f32
    %61 = math.exp %60 : f32
    %62 = math.log1p %61 : f32
    %63 = arith.addf %58, %62 : f32
    %c0_18 = arith.constant 0 : index
    %64 = memref.load %arg3[%c0_18] : memref<1xf32, #tpu.memory_space<smem>>
    memref.store %63, %arg3[%c0_18] : memref<1xf32, #tpu.memory_space<smem>>
    return
  }
  func.func @transform_0(%arg0: i32) -> (i32, i32) {
    %c0_i32 = arith.constant 0 : i32
    %c0_i32_0 = arith.constant 0 : i32
    %c0_i32_1 = arith.constant 0 : i32
    return %c0_i32, %c0_i32_0 : i32, i32
  }
  func.func @transform_1(%arg0: i32) -> (i32, i32) {
    %c0_i32 = arith.constant 0 : i32
    %c0_i32_0 = arith.constant 0 : i32
    %c0_i32_1 = arith.constant 0 : i32
    return %c0_i32, %c0_i32_0 : i32, i32
  }
  func.func @transform_2(%arg0: i32) -> i32 {
    %c0_i32 = arith.constant 0 : i32
    %c0_i32_0 = arith.constant 0 : i32
    return %c0_i32 : i32
  }
}

</mosaic_0001>

<bundles_post_ra>
// kernel: tpu_custom_call.1
= control target key start
LH: loop header
LB: loop body
LE: loop exit
PB: predicated region body
PF: predicated region fallthrough
CT: control target
= control target key end

     0   :  { %7 = vsyncpa [#allocation3], 0  ;;  %s295_s0 = inlined_call_operand.hbm [shape: f32[1,128], index: 0, kind: input, shape index: {}]   ;;  %s296_s1 = inlined_call_operand.hbm [shape: f32[1,128], index: 1, kind: input, shape index: {}]   ;;  %s297_s2 = inlined_call_operand.hbm [shape: f32[1], index: 2, kind: output, shape index: {}]  }
   0x1   :  { %8 = vsyncpa [#allocation6], 0 }
   0x2   :  { %9 = vsyncpa [#allocation4], 0  ;;  %s15_s11 = sshll.u32 %s295_s0, 4  ;;  %s259_s12 = smov [#allocation2]   ;;  %s16_s11 = int_to_ptr.hbm [resolvable:$true] %s15_s11 }
   0x3   :  { %s17_s13 = sshll.u32 %s259_s12, 4  ;;  %s26_s16 = sshll.u32 %s296_s1, 4  ;;  %s18_s13 = int_to_ptr.vmem [resolvable:$true] %s17_s13  ;;  %s27_s16 = int_to_ptr.hbm [resolvable:$true] %s26_s16 }
   0x4   :  { %20 = dma.hbm_to_vmem [thread:$0]  %s16_s11, 16, %s18_s13, [#allocation3]  }
   0x5   :  { %s260_s17 = smov [#allocation5]  }
   0x6   :  { %s28_s18 = sshll.u32 %s260_s17, 4  ;;  %s29_s18 = int_to_ptr.vmem [resolvable:$true] %s28_s18 }
   0x7   :  { %31 = dma.hbm_to_vmem [thread:$0]  %s27_s16, 16, %s29_s18, [#allocation6]  }
   0x8   :  { %253 = dma.done.wait [#allocation3], 16  }
   0x9   :  { %254 = vsyncadd [#allocation3], 4294967280 }
   0xa   :  { %255 = dma.done.wait [#allocation6], 16  }
   0xb   :  { %256 = vsyncadd [#allocation6], 4294967280  ;;  %v47_v0 = vlaneseq  ;;  %v40_v2 = vld [vmem:[#allocation2] sm:$0x1]  ;;  %vm55_vm1 = vcmask 1040384   ;;  %s147_s3 = sshll.u32 %s297_s2, 4  ;;  %s148_s3 = int_to_ptr.hbm [resolvable:$true] %s147_s3 }
   0xc   :  { %v41_v5 = vsub.f32 1.25, %v40_v2  ;;  %v159_v7 = vadd.f32 -0.75, %v40_v2  ;;  %v85_v21 = vld [vmem:[#allocation5] sm:$0x1]  ;;  %s261_s4 = smov 0.0   ;;  %s262_s8 = smov [#allocation7]  }
   0xd   :  { %v48_v1 = vshrl.u32 %v47_v0, 7  ;;  %v50_v3 = vand.u32 127, %v47_v0  ;;  %v86_v22 = vadd.f32 0.25, %v85_v21  ;;  %v160_v23 = vadd.f32 -0.25, %v85_v21 }
   0xe   :  { %v42_v6 = vmax.f32 %v41_v5, 0.0 }
   0xf   :  { %v51_v4 = vmul.u32 128, %v48_v1  ;;  %v87_v24 = vmax.f32 %v86_v22, 0.0 }
  0x10   :  { %v43_v9 = vsub.f32 0.0, %v42_v6 }
  0x11   :  { %v52_v8 = vadd.s32 %v51_v4, %v50_v3  ;;  %v89_v25 = vmul.f32 %v160_v23, %v87_v24 }
  0x12   :  { %v45_v10 = vmul.f32 %v159_v7, %v43_v9 }
  0x13   :  { %vm53_vm0 = vcmp.lt.s32.totalorder %v52_v8, 64  ;;  %v90_v26 = vmul.f32 80.0, %v89_v25 }
  0x14   :  { %v46_v11 = vmul.f32 80.0, %v45_v10 }
  0x15   :  { %v91_v27 = vsel %vm55_vm1, %v90_v26, -inf }
  0x16   :  { %v54_v12 = vsel %vm53_vm0, %v46_v11, -1e+30  ;;  %92 = vmax.xlane.f32.xlu1 %v91_v27 }
  0x17   :  { %v56_v13 = vsel %vm55_vm1, %v54_v12, -inf }
  0x18   :  { %57 = vmax.xlane.f32.xlu0 %v56_v13 }
  0x89   :  { %v93_v40 = vpop.xlane.xlu1 %92 }
  0x8a   :  { %v94_v41 = vrot.slane %v93_v40, 4 }
  0x8b   :  { %v58_v14 = vpop.xlane.xlu0 %57 }
  0x8c   :  { %v59_v15 = vrot.slane %v58_v14, 4  ;;  %v95_v42 = vmax.f32 %v93_v40, %v94_v41 }
  0x8e   :  { %v60_v16 = vmax.f32 %v58_v14, %v59_v15  ;;  %v96_v43 = vrot.slane %v95_v42, 2 }
  0x90   :  { %v61_v17 = vrot.slane %v60_v16, 2  ;;  %v97_v45 = vmax.f32 %v95_v42, %v96_v43 }
  0x92   :  { %v62_v18 = vmax.f32 %v60_v16, %v61_v17  ;;  %v98_v46 = vrot.slane %v97_v45, 1 }
  0x94   :  { %v63_v19 = vrot.slane %v62_v18, 1  ;;  %v99_v49 = vmax.f32 %v97_v45, %v98_v46 }
  0x96   :  { %v64_v20 = vmax.f32 %v62_v18, %v63_v19 }
  0x98   :  { %161 = vpush %v64_v20 }
  0xc9   :  { %s286_s0 = spop %161 }
  0xca   :  { %v66_v28 = vstv %s286_s0 }
  0xcb   :  { %v67_v29 = vsub.f32 %v54_v12, %v66_v28 }
  0xcd   :  { %v68_v30 = vmul.f32 1.442695, %v67_v29 }
  0xcf   :  { %181 = vpow2.f32 %v68_v30 }
  0xd5   :  { %v182_v31 = vpop.eup %181 }
  0xd6   :  { %v70_v32 = vsel %vm55_vm1, %v182_v31, 0.0 }
  0xd7   :  { %71 = vadd.xlane.f32.xlu0 %v70_v32 }
 0x14a   :  { %v72_v33 = vpop.xlane.xlu0 %71 }
 0x14b   :  { %v73_v34 = vrot.slane %v72_v33, 4 }
 0x14d   :  { %v74_v35 = vadd.f32 %v73_v34, %v72_v33 }
 0x14f   :  { %v75_v36 = vrot.slane %v74_v35, 2 }
 0x151   :  { %v76_v37 = vadd.f32 %v75_v36, %v74_v35 }
 0x153   :  { %v77_v38 = vrot.slane %v76_v37, 1 }
 0x155   :  { %v78_v39 = vadd.f32 %v77_v38, %v76_v37 }
 0x157   :  { %163 = vpush %v78_v39 }
 0x188   :  { %s164_s1 = spop %163 }
 0x189   :  { %v80_v44 = vstv %s164_s1 }
 0x18a   :  { %183 = vlog2.f32 %v80_v44 }
 0x190   :  { %v184_v47 = vpop.eup %183 }
 0x191   :  { %v82_v48 = vmul.f32 0.6931472, %v184_v47 }
 0x193   :  { %165 = vpush %v82_v48 }
 0x194   :  { %167 = vpush %v99_v49 }
 0x1c4   :  { %s166_s19 = spop %165 }
 0x1c5   :  { %s168_s20 = spop %167  ;;  %s84_s22 = sadd.f32 %s166_s19, %s286_s0 }
 0x1c6   :  { %v101_v50 = vstv %s168_s20 }
 0x1c7   :  { %v102_v51 = vsub.f32 %v90_v26, %v101_v50 }
 0x1c9   :  { %v103_v52 = vmul.f32 1.442695, %v102_v51 }
 0x1cb   :  { %185 = vpow2.f32 %v103_v52 }
 0x1d1   :  { %v186_v53 = vpop.eup %185 }
 0x1d2   :  { %v105_v54 = vsel %vm55_vm1, %v186_v53, 0.0 }
 0x1d3   :  { %106 = vadd.xlane.f32.xlu1 %v105_v54 }
 0x246   :  { %v107_v55 = vpop.xlane.xlu1 %106 }
 0x247   :  { %v108_v56 = vrot.slane %v107_v55, 4 }
 0x249   :  { %v109_v57 = vadd.f32 %v108_v56, %v107_v55 }
 0x24b   :  { %v110_v58 = vrot.slane %v109_v57, 2 }
 0x24d   :  { %v111_v59 = vadd.f32 %v110_v58, %v109_v57 }
 0x24f   :  { %v112_v60 = vrot.slane %v111_v59, 1 }
 0x251   :  { %v113_v61 = vadd.f32 %v112_v60, %v111_v59 }
 0x253   :  { %169 = vpush %v113_v61 }
 0x284   :  { %s170_s21 = spop %169 }
 0x285   :  { %v115_v62 = vstv %s170_s21 }
 0x286   :  { %187 = vlog2.f32 %v115_v62 }
 0x28c   :  { %v188_v63 = vpop.eup %187 }
 0x28d   :  { %v117_v0 = vmul.f32 0.6931472, %v188_v63 }
 0x28f   :  { %171 = vpush %v117_v0 }
 0x2c0   :  { %s172_s23 = spop %171 }
 0x2c1   :  { %s119_s24 = sadd.f32 %s172_s23, %s168_s20 }
 0x2c3   :  { %s120_s25 = sadd.f32 %s119_s24, %s84_s22 }
 0x2c5   :  { %s122_s26 = sand.u32 2147483647, %s120_s25  ;;  %s121_s5 = smax.f32 %s261_s4, %s120_s25 }
 0x2c6   :  { %s123_s27 = ssub.f32 0.0, %s122_s26 }
 0x2c8   :  { %v124_v1 = vstv %s123_s27 }
 0x2c9   :  { %v125_v2 = vmul.f32 1.442695, %v124_v1 }
 0x2cb   :  { %189 = vpow2.f32 %v125_v2 }
 0x2d1   :  { %v190_v3 = vpop.eup %189 }
 0x2d2   :  { %173 = vpush %v190_v3 }
 0x303   :  { %s174_s28 = spop %173 }
 0x304   :  { %v128_v4 = vstv %s174_s28 }
 0x305   :  { %v129_v5 = vadd.f32 1.0, %v128_v4  ;;  %v132_v6 = vmul.f32 -0.5, %v128_v4  ;;  %v135_v8 = vand.u32 2147483647, %v128_v4 }
 0x307   :  { %191 = vlog2.f32 %v129_v5  ;;  %v133_v7 = vadd.f32 1.0, %v132_v6  ;;  %vm136_vm2 = vcmp.lt.f32.partialorder %v135_v8, 0.0004427343 }
 0x309   :  { %v134_v10 = vmul.f32 %v133_v7, %v128_v4 }
 0x30d   :  { %v192_v9 = vpop.eup %191 }
 0x30e   :  { %v131_v11 = vmul.f32 0.6931472, %v192_v9 }
 0x310   :  { %v137_v12 = vsel %vm136_vm2, %v134_v10, %v131_v11 }
 0x311   :  { %175 = vpush %v137_v12 }
 0x342   :  { %s176_s6 = spop %175 }
 0x343   :  { %s139_s7 = sadd.f32 %s176_s6, %s121_s5 }
 0x345   :  { %141 = sst [smem:[#allocation7]] %s139_s7 }
 0x346   :  { %150 = dma.smem_to_hbm %s262_s8, 16, %s148_s3, [#allocation4]  }
 0x347   :  { %257 = dma.done.wait [#allocation4], 16  }
 0x348   :  { %258 = vsyncadd [#allocation4], 4294967280 }
 0x349   :  { %155 = sfence }
 0x34a   :  { %156 = vsyncpa [#allocation3], 1 }
 0x34b   :  { %157 = vsyncpa [#allocation6], 1 }
 0x34c   :  { %158 = vsyncpa [#allocation4], 1 }

</bundles_post_ra>
